<compile_context>
chip_gen: v7x
topology: tpu7x:2x2x1
jax: 0.10.0
libtpu: 0.0.40
codegen_flags: <defaults>
</compile_context>

<pallas_src>
import jax
import jax.numpy as jnp
from jax import lax
from jax.experimental import pallas as pl
from jax.experimental.pallas import tpu as pltpu

_MIB = 1024 * 1024


def _round_up(x: int, m: int) -> int:
    return ((x + m - 1) // m) * m


def _vmem_safe_limit_bytes() -> int:
    """~75% of per-core VMEM; conservative 64 MiB (v7x) fallback if query fails."""
    try:
        cap = int(pltpu.get_tpu_info().vmem_capacity_bytes)
    except Exception:  # e.g. older jax / interpret mode
        cap = 64 * _MIB
    return min(int(cap * 3 // 4), 100 * _MIB)


def _resident_kernel(x_ref, w_ref, gamma_ref, beta_ref, o_ref):
    """One (N, TN) output tile; x is VMEM-resident, full-K contraction in one dot."""
    y = jnp.dot(x_ref[...], w_ref[...], preferred_element_type=jnp.float32)  # (N, TN) f32
    # BatchNorm1d (training mode): biased variance over the full batch axis.
    mean = jnp.mean(y, axis=0, keepdims=True)                   # (1, TN)
    d = y - mean
    var = jnp.mean(d * d, axis=0, keepdims=True)                # (1, TN)
    scale = gamma_ref[...] * lax.rsqrt(var + 1e-5)
    shift = beta_ref[...] - mean * scale
    o_ref[...] = jnp.maximum(y * scale + shift, 0.0)            # fused affine + ReLU


def _tiled_kernel(x_ref, w_ref, gamma_ref, beta_ref, o_ref, colsum_ref):
    """K-tiled variant: accumulate partial products directly into o_ref (f32)."""
    k = pl.program_id(1)
    part = jnp.dot(x_ref[...], w_ref[...], preferred_element_type=jnp.float32)  # (N, TN)
    psum = jnp.sum(part, axis=0, keepdims=True)                 # (1, TN) column sums

    @pl.when(k == 0)
    def _():  # first K step initializes o_ref directly: no zero-fill + RMW pass
        o_ref[...] = part
        colsum_ref[...] = psum

    @pl.when(k > 0)
    def _():
        o_ref[...] += part
        colsum_ref[...] += psum

    @pl.when(k == pl.num_programs(1) - 1)
    def _():  # fused BN (batch stats) + ReLU epilogue, in place on o_ref
        y = o_ref[...]
        mean = colsum_ref[...] * (1.0 / y.shape[0])
        d = y - mean
        var = jnp.mean(d * d, axis=0, keepdims=True)
        scale = gamma_ref[...] * lax.rsqrt(var + 1e-5)
        shift = beta_ref[...] - mean * scale
        o_ref[...] = jnp.maximum(y * scale + shift, 0.0)


def linear_block(x, w, b, gamma, beta, *, tn_max=256, force_tiled_tk=None):
    """LinearBlock forward (bn=True, relu=True), training-mode batch statistics.

    x: (N, D_in) f32
    w: (D_out, D_in) f32   (PyTorch nn.Linear weight layout)
    b, gamma, beta: (D_out,) f32.  `b` is accepted for API parity but is
    algebraically cancelled by BatchNorm's batch-mean subtraction, so it is unused.
    """
    del b  # cancels under BatchNorm's batch-mean subtraction
    n, d_in = x.shape
    d_out = w.shape[0]

    # Lane-dense output tile width (multiple of 128, at most tn_max).
    tn = _round_up(d_out, 128) if d_out <= tn_max else tn_max
    d_out_p = _round_up(d_out, tn)
    pad_out = d_out_p - d_out

    safe_limit = _vmem_safe_limit_bytes()
    budget = safe_limit - 4 * _MIB

    # One-time / small parameter prep: pad D_out, pre-transpose w to (D_in, D_out_p),
    # cast matmul operands to bf16 (MXU-native on v5e/v6e/v7x).  BN math stays f32.
    wt = jnp.pad(w, ((0, pad_out), (0, 0))).T.astype(jnp.bfloat16)   # (D_in, D_out_p)
    g2 = jnp.pad(gamma, (0, pad_out)).reshape(1, d_out_p).astype(jnp.float32)
    be2 = jnp.pad(beta, (0, pad_out)).reshape(1, d_out_p).astype(jnp.float32)
    xb = x.astype(jnp.bfloat16)

    grid_j = d_out_p // tn
    out_bytes = 2 * n * tn * 4                                        # double-buffered f32 out
    resident_bytes = out_bytes + 2 * n * d_in * 2 + 2 * d_in * tn * 2

    if force_tiled_tk is None and (resident_bytes <= budget or d_in <= 512):
        # ---- resident-x regime: x is one VMEM block, one dot per D_out tile -------
        # TODO(synk): for batches so large that even this exceeds VMEM (and d_in is
        # small so K tiling can't help), tile N with a two-pass BN; not implemented.
        vmem_limit = int(min(max(resident_bytes + 8 * _MIB, 32 * _MIB), safe_limit))
        out = pl.pallas_call(
            _resident_kernel,
            out_shape=jax.ShapeDtypeStruct((n, d_out_p), jnp.float32),
            grid_spec=pltpu.PrefetchScalarGridSpec(
                num_scalar_prefetch=0,
                grid=(grid_j,),
                in_specs=[
                    pl.BlockSpec((n, d_in), lambda j: (0, 0)),     # x: resident, fetched once
                    pl.BlockSpec((d_in, tn), lambda j: (0, j)),    # w^T tile
                    pl.BlockSpec((1, tn), lambda j: (0, j)),       # gamma
                    pl.BlockSpec((1, tn), lambda j: (0, j)),       # beta
                ],
                out_specs=pl.BlockSpec((n, tn), lambda j: (0, j)),
            ),
            compiler_params=pltpu.CompilerParams(
                dimension_semantics=("parallel",),
                vmem_limit_bytes=vmem_limit,
            ),
        )(xb, wt, g2, be2)
    else:
        # ---- tiled-K fallback: x too large to keep resident --------------------
        if force_tiled_tk is not None:
            tk = int(force_tiled_tk)
        else:
            tk = 128
            for cand in (1024, 512, 256):      # largest tk that adds no extra K pad
                if (_round_up(d_in, cand) == _round_up(d_in, 128)
                        and out_bytes + 2 * n * cand * 2 + 2 * cand * tn * 2 <= budget):
                    tk = cand
                    break
        d_in_p = _round_up(d_in, tk)
        if d_in_p != d_in:
            # TODO(synk): per-call activation pad is extra HBM traffic; choose D_in as
            # a multiple of 128 upstream to avoid this fallback.
            xb = jnp.pad(xb, ((0, 0), (0, d_in_p - d_in)))
            wt = jnp.pad(wt, ((0, d_in_p - d_in), (0, 0)))
        tiled_bytes = out_bytes + 2 * n * tk * 2 + 2 * tk * tn * 2
        vmem_limit = int(min(max(tiled_bytes + 8 * _MIB, 32 * _MIB), safe_limit))
        out = pl.pallas_call(
            _tiled_kernel,
            out_shape=jax.ShapeDtypeStruct((n, d_out_p), jnp.float32),
            grid_spec=pltpu.PrefetchScalarGridSpec(
                num_scalar_prefetch=0,
                grid=(grid_j, d_in_p // tk),
                in_specs=[
                    pl.BlockSpec((n, tk), lambda j, k: (0, k)),    # x K-slab
                    pl.BlockSpec((tk, tn), lambda j, k: (k, j)),   # w^T tile
                    pl.BlockSpec((1, tn), lambda j, k: (0, j)),    # gamma
                    pl.BlockSpec((1, tn), lambda j, k: (0, j)),    # beta
                ],
                out_specs=pl.BlockSpec((n, tn), lambda j, k: (0, j)),   # resident over k
                scratch_shapes=[pltpu.VMEM((1, tn), jnp.float32)],      # column sums
            ),
            compiler_params=pltpu.CompilerParams(
                dimension_semantics=("parallel", "arbitrary"),
                vmem_limit_bytes=vmem_limit,
            ),
        )(xb, wt, g2, be2)

    return out[:, :d_out] if d_out_p != d_out else out


def reference(x, w, b, gamma, beta):
    y = x @ w.T + b
    mean = jnp.mean(y, axis=0, keepdims=True)
    var = jnp.mean((y - mean) ** 2, axis=0, keepdims=True)
    y = (y - mean) * lax.rsqrt(var + 1e-5)
    return jnp.maximum(y * gamma + beta, 0.0)


if __name__ == "__main__":
    key = jax.random.PRNGKey(0)

    def run_case(case_id, n, d_in, d_out, force_tiled_tk=None):
        k1, k2, k3, k4, k5 = jax.random.split(jax.random.fold_in(key, case_id), 5)
        x = jax.random.normal(k1, (n, d_in), jnp.float32)
        bound = 1.0 / (d_in ** 0.5)           # nn.Linear default init bound
        w = jax.random.uniform(k2, (d_out, d_in), jnp.float32, -bound, bound)
        b = jax.random.uniform(k3, (d_out,), jnp.float32, -bound, bound)
        gamma = jax.random.uniform(k4, (d_out,), jnp.float32, 0.5, 1.5)
        beta = 0.1 * jax.random.normal(k5, (d_out,), jnp.float32)

        out = linear_block(x, w, b, gamma, beta, force_tiled_tk=force_tiled_tk)
        jax.block_until_ready(out)
        ref = reference(x, w, b, gamma, beta)
        assert out.shape == (n, d_out)
        # bf16 matmul operands (f32 accumulation / stats) -> loosened tolerance.
        assert jnp.allclose(out, ref, atol=3e-2, rtol=3e-2), (
            f"case {case_id}: max abs err = {jnp.max(jnp.abs(out - ref))}")

    run_case(0, 16, 32, 64)                          # resident-x path (default)
    run_case(1, 64, 384, 320, force_tiled_tk=128)    # tiled-K path, 3 K steps, D_out pad
    run_case(2, 32, 200, 72, force_tiled_tk=128)     # ragged dims -> K-pad fallback

    print("KERNEL_OK")
</pallas_src>

<mosaic_0001>
module attributes {stable_mosaic.version = 11 : i64} {
  func.func @_resident_kernel(%arg0: i32, %arg1: memref<16x32xbf16, #tpu.memory_space<vmem>>, %arg2: memref<32x128xbf16, #tpu.memory_space<vmem>>, %arg3: memref<1x128xf32, #tpu.memory_space<vmem>>, %arg4: memref<1x128xf32, #tpu.memory_space<vmem>>, %arg5: memref<16x128xf32, #tpu.memory_space<vmem>>) attributes {dimension_semantics = [#tpu.dimension_semantics<parallel>], iteration_bounds = array<i64: 1>, scalar_prefetch = 0 : i64, scratch_operands = 0 : i64, tpu.core_type = #tpu.core_type<tc>, window_params = [{pipeline_mode = #tpu.pipeline_mode<synchronous>, transform_indices = @transform_0, window_bounds = array<i64: 16, 32>}, {transform_indices = @transform_1, window_bounds = array<i64: 32, 128>}, {transform_indices = @transform_2, window_bounds = array<i64: 1, 128>}, {transform_indices = @transform_3, window_bounds = array<i64: 1, 128>}, {transform_indices = @transform_4, window_bounds = array<i64: 16, 128>}]} {
    %c0 = arith.constant 0 : index
    %c0_0 = arith.constant 0 : index
    %0 = vector.load %arg1[%c0, %c0_0] : memref<16x32xbf16, #tpu.memory_space<vmem>>, vector<16x32xbf16>
    %c0_1 = arith.constant 0 : index
    %c0_2 = arith.constant 0 : index
    %1 = vector.load %arg2[%c0_1, %c0_2] : memref<32x128xbf16, #tpu.memory_space<vmem>>, vector<32x128xbf16>
    %cst = arith.constant dense<0.000000e+00> : vector<16x128xf32>
    %2 = tpu.matmul %0, %1, %cst {dimension_numbers = #tpu.dot_dimension_numbers<[1], [0], [0], [1], [0, 0, 1, 1], [], []>} : vector<16x32xbf16>, vector<32x128xbf16>, vector<16x128xf32> -> vector<16x128xf32>
    %cst_3 = arith.constant dense<0.000000e+00> : vector<128xf32>
    %3 = vector.multi_reduction <add>, %2, %cst_3 [0] : vector<16x128xf32> to vector<128xf32>
    %4 = vector.shape_cast %3 : vector<128xf32> to vector<1x128xf32>
    %cst_4 = arith.constant 1.600000e+01 : f32
    %5 = vector.broadcast %cst_4 : f32 to vector<1x128xf32>
    %6 = arith.divf %4, %5 : vector<1x128xf32>
    %7 = vector.broadcast %6 : vector<1x128xf32> to vector<16x128xf32>
    %8 = arith.subf %2, %7 : vector<16x128xf32>
    %9 = arith.mulf %8, %8 : vector<16x128xf32>
    %cst_5 = arith.constant dense<0.000000e+00> : vector<128xf32>
    %10 = vector.multi_reduction <add>, %9, %cst_5 [0] : vector<16x128xf32> to vector<128xf32>
    %11 = vector.shape_cast %10 : vector<128xf32> to vector<1x128xf32>
    %cst_6 = arith.constant 1.600000e+01 : f32
    %12 = vector.broadcast %cst_6 : f32 to vector<1x128xf32>
    %13 = arith.divf %11, %12 : vector<1x128xf32>
    %c0_7 = arith.constant 0 : index
    %c0_8 = arith.constant 0 : index
    %14 = vector.load %arg3[%c0_7, %c0_8] : memref<1x128xf32, #tpu.memory_space<vmem>>, vector<1x128xf32>
    %cst_9 = arith.constant 9.99999974E-6 : f32
    %15 = vector.broadcast %cst_9 : f32 to vector<1x128xf32>
    %16 = arith.addf %13, %15 : vector<1x128xf32>
    %17 = math.rsqrt %16 : vector<1x128xf32>
    %18 = arith.mulf %14, %17 : vector<1x128xf32>
    %c0_10 = arith.constant 0 : index
    %c0_11 = arith.constant 0 : index
    %19 = vector.load %arg4[%c0_10, %c0_11] : memref<1x128xf32, #tpu.memory_space<vmem>>, vector<1x128xf32>
    %20 = arith.mulf %6, %18 : vector<1x128xf32>
    %21 = arith.subf %19, %20 : vector<1x128xf32>
    %22 = vector.broadcast %18 : vector<1x128xf32> to vector<16x128xf32>
    %23 = arith.mulf %2, %22 : vector<16x128xf32>
    %24 = vector.broadcast %21 : vector<1x128xf32> to vector<16x128xf32>
    %25 = arith.addf %23, %24 : vector<16x128xf32>
    %cst_12 = arith.constant 0.000000e+00 : f32
    %26 = vector.broadcast %cst_12 : f32 to vector<16x128xf32>
    %27 = arith.maximumf %25, %26 : vector<16x128xf32>
    %c0_13 = arith.constant 0 : index
    %c0_14 = arith.constant 0 : index
    %28 = vector.load %arg5[%c0_13, %c0_14] : memref<16x128xf32, #tpu.memory_space<vmem>>, vector<16x128xf32>
    tpu.vector_store %arg5[%c0_13, %c0_14], %27 {strides = array<i32>} : memref<16x128xf32, #tpu.memory_space<vmem>>, vector<16x128xf32>,
    return
  }
  func.func @transform_0(%arg0: i32) -> (i32, i32) {
    %c0_i32 = arith.constant 0 : i32
    %c0_i32_0 = arith.constant 0 : i32
    %c0_i32_1 = arith.constant 0 : i32
    return %c0_i32, %c0_i32_0 : i32, i32
  }
  func.func @transform_1(%arg0: i32) -> (i32, i32) {
    %c0_i32 = arith.constant 0 : i32
    %c0_i32_0 = arith.constant 0 : i32
    return %c0_i32, %arg0 : i32, i32
  }
  func.func @transform_2(%arg0: i32) -> (i32, i32) {
    %c0_i32 = arith.constant 0 : i32
    %c0_i32_0 = arith.constant 0 : i32
    return %c0_i32, %arg0 : i32, i32
  }
  func.func @transform_3(%arg0: i32) -> (i32, i32) {
    %c0_i32 = arith.constant 0 : i32
    %c0_i32_0 = arith.constant 0 : i32
    return %c0_i32, %arg0 : i32, i32
  }
  func.func @transform_4(%arg0: i32) -> (i32, i32) {
    %c0_i32 = arith.constant 0 : i32
    %c0_i32_0 = arith.constant 0 : i32
    return %c0_i32, %arg0 : i32, i32
  }
}

</mosaic_0001>

<bundles_post_ra>
// kernel: tpu_custom_call.1
= control target key start
LH: loop header
LB: loop body
LE: loop exit
PB: predicated region body
PF: predicated region fallthrough
CT: control target
= control target key end

     0   :  { %9 = vsyncpa [#allocation3], 0  ;;  %s358_s0 = inlined_call_operand.hbm [shape: bf16[16,32], index: 0, kind: input, shape index: {}]   ;;  %s359_s1 = inlined_call_operand.hbm [shape: bf16[32,128], index: 1, kind: input, shape index: {}]   ;;  %s360_s2 = inlined_call_operand.vmem [shape: f32[1,128], index: 2, kind: input, shape index: {}]   ;;  %s361_s3 = inlined_call_operand.vmem [shape: f32[1,128], index: 3, kind: input, shape index: {}]   ;;  %s362_s4 = inlined_call_operand.hbm [shape: f32[16,128], index: 4, kind: output, shape index: {}]  }
   0x1   :  { %10 = vsyncpa [#allocation6], 0 }
   0x2   :  { %11 = vsyncpa [#allocation4], 0  ;;  %s282_s15 = smov [#allocation2]   ;;  %s210_s19 = scalar_lea.hbm %s358_s0, 128 }
   0x3   :  { %s17_s16 = sshll.u32 %s282_s15, 4  ;;  %p211_p0 = scmp.ne.s32.totalorder %s358_s0, %s210_s19  ;;  %s18_s16 = int_to_ptr.vmem [resolvable:$true] %s17_s16 }
   0x4   :  { %p214_p1 = scmp.lt.u32.totalorder %s210_s19, %s358_s0 }
   0x6   :  { %p216_p2 = pnand %p214_p1, %p211_p0 }
   0x8   :  { %219 = shalt.err (!%p216_p2)
}
   0x9   :  { %s220_s24 = scalar_lea.vmem %s18_s16, 128  ;;  %p225_p4 = scmp.lt.s32.totalorder %s18_s16, %s18_s16 }
   0xa   :  { %p221_p3 = scmp.ne.s32.totalorder %s18_s16, %s220_s24  ;;  %p226_p5 = scmp.lt.s32.totalorder %s220_s24, %s220_s24 }
   0xc   :  { %p227_p6 = por %p226_p5, %p225_p4 }
   0xe   :  { %p228_p7 = pnand %p227_p6, %p221_p3 }
  0x10   :  { %231 = shalt.err (!%p228_p7)
}
  0x11   :  { %s283_s25 = smov 64   ;;  %s284_s26 = smov 4  }
  0x12   :  { %23 = dma.hbm_to_vmem [thread:$0]  %s358_s0, 128, %s18_s16, [#allocation3], %s283_s25, %s283_s25, %s284_s26  }
  0x13   :  { %s285_s29 = smov [#allocation5]   ;;  %s232_s7 = scalar_lea.hbm %s359_s1, 256 }
  0x14   :  { %s29_s30 = sshll.u32 %s285_s29, 4  ;;  %p233_p8 = scmp.ne.s32.totalorder %s359_s1, %s232_s7  ;;  %s30_s30 = int_to_ptr.vmem [resolvable:$true] %s29_s30 }
  0x15   :  { %p236_p9 = scmp.lt.u32.totalorder %s232_s7, %s359_s1 }
  0x17   :  { %p238_p10 = pnand %p236_p9, %p233_p8 }
  0x19   :  { %241 = shalt.err (!%p238_p10)
}
  0x1a   :  { %s242_s12 = scalar_lea.vmem %s30_s30, 256  ;;  %p247_p12 = scmp.lt.s32.totalorder %s30_s30, %s30_s30 }
  0x1b   :  { %p243_p11 = scmp.ne.s32.totalorder %s30_s30, %s242_s12  ;;  %p248_p13 = scmp.lt.s32.totalorder %s242_s12, %s242_s12 }
  0x1d   :  { %p249_p0 = por %p248_p13, %p247_p12 }
  0x1f   :  { %p250_p1 = pnand %p249_p0, %p243_p11 }
  0x21   :  { %253 = shalt.err (!%p250_p1)
}
  0x22   :  { %35 = dma.hbm_to_vmem [thread:$0]  %s359_s1, 256, %s30_s30, [#allocation6], %s283_s25, %s283_s25, %s284_s26  }
  0x23   :  { %276 = dma.done.wait [#allocation3], 128  }
  0x24   :  { %277 = vsyncadd [#allocation3], 4294967168 }
  0x25   :  { %278 = dma.done.wait [#allocation6], 256  }
  0x26   :  { %279 = vsyncadd [#allocation6], 4294967040  ;;  %v286_v0 = vmov 0.0   ;;  %vm287_vm0 = vmmov 0   ;;  %v205_v1 = vld [vmem:[#allocation5] sm:$0xff]   ;;  %v206_v2 = vld [vmem:[#allocation5 + $0x8] sm:$0xff]   ;;  %v144_v29 = vlaneseq }
  0x27   :  { %188 = vmatprep.subr.bf16.mxu0 %v286_v0  ;;  %192 = vmatprep.mubr.msk.bf16.mxu0 %vm287_vm0, %v286_v0  ;;  %v207_v3 = vld [vmem:[#allocation2] sm:$0xff]   ;;  %vm70_vm1 = vcmask 261120   ;;  %s288_s17 = smov [#allocation7]  }
  0x28   :  { %189 = vmatpush3.bf16.msra.mxu0 %v205_v1  ;;  %v145_v30 = vshrl.u32 %v144_v29, 7  ;;  %v136_v31 = vld [vmem:[%s360_s2] sm:$0x1]  ;;  %s168_s18 = sshll.u32 %s288_s17, 4  ;;  %s169_s18 = int_to_ptr.vmem [resolvable:$true] %s168_s18 }
  0x29   :  { %190 = vmatprep.subr.bf16.mxu0 %v286_v0  ;;  %v140_v35 = vld [vmem:[%s361_s3] sm:$0x1]  ;;  %s254_s2 = scalar_lea.vmem %s169_s18, 256  ;;  %p259_p3 = scmp.lt.s32.totalorder %s169_s18, %s169_s18 }
  0x2a   :  { %v146_v32 = vsub.s32 0, %v145_v30  ;;  %p255_p2 = scmp.ne.s32.totalorder %s169_s18, %s254_s2  ;;  %p260_p4 = scmp.lt.s32.totalorder %s254_s2, %s254_s2 }
  0x2c   :  { %191 = vmatpush3.bf16.msra.mxu0 %v206_v2  ;;  %p261_p5 = por %p260_p4, %p259_p3 }
  0x2e   :  { %p262_p6 = pnand %p261_p5, %p255_p2 }
  0x2f   :  { %193 = vmatmul.mubr.msk.bf16.vlgmr.msra.gmra.mrb[0].mxu0 %vm70_vm1, %v207_v3 }
 0x102   :  { %v108_v4 = vpop.f32.mrb[0].mxu0 }
 0x103   :  { %v194_v5 = vpop.f32.mrb[1].mxu0 }
 0x104   :  { %v111_v6 = vpop.f32.mrb[2].mxu0 }
 0x105   :  { %v115_v7 = vadd.f32 %v111_v6, %v108_v4  ;;  %v195_v8 = vpop.f32.mrb[3].mxu0 }
 0x107   :  { %v116_v9 = vrot.slane %v115_v7, 4 }
 0x109   :  { %v117_v10 = vadd.f32 %v116_v9, %v115_v7 }
 0x10b   :  { %v118_v11 = vrot.slane %v117_v10, 2 }
 0x10d   :  { %v119_v12 = vadd.f32 %v118_v11, %v117_v10 }
 0x10f   :  { %v120_v13 = vrot.slane %v119_v12, 1 }
 0x111   :  { %v121_v14 = vadd.f32 %v120_v13, %v119_v12 }
 0x113   :  { %v123_v15 = vmul.f32 0.0625, %v121_v14 }
 0x115   :  { %v124_v16 = vsub.f32 %v108_v4, %v123_v15  ;;  %v125_v17 = vsub.f32 %v111_v6, %v123_v15 }
 0x117   :  { %v126_v18 = vmul.f32 %v124_v16, %v124_v16  ;;  %v127_v19 = vmul.f32 %v125_v17, %v125_v17 }
 0x119   :  { %v128_v20 = vadd.f32 %v127_v19, %v126_v18 }
 0x11b   :  { %v129_v21 = vrot.slane %v128_v20, 4 }
 0x11d   :  { %v130_v22 = vadd.f32 %v129_v21, %v128_v20 }
 0x11f   :  { %v131_v23 = vrot.slane %v130_v22, 2 }
 0x121   :  { %v132_v24 = vadd.f32 %v131_v23, %v130_v22 }
 0x123   :  { %v133_v25 = vrot.slane %v132_v24, 1 }
 0x125   :  { %v134_v26 = vadd.f32 %v133_v25, %v132_v24 }
 0x127   :  { %v135_v27 = vmul.f32 0.0625, %v134_v26 }
 0x129   :  { %v137_v28 = vadd.f32 1e-05, %v135_v27 }
 0x12b   :  { %208 = vrsqrt.f32 %v137_v28 }
 0x135   :  { %v209_v33 = vpop.eup %208 }
 0x136   :  { %v139_v34 = vmul.f32 %v209_v33, %v136_v31 }
 0x138   :  { %v141_v36 = vmul.f32 %v139_v34, %v123_v15  ;;  %v147_v37 = vrot.slane %v139_v34, %v146_v32 }
 0x13a   :  { %v142_v38 = vsub.f32 %v140_v35, %v141_v36  ;;  %v149_v39 = vmul.f32 %v147_v37, %v108_v4  ;;  %v150_v40 = vmul.f32 %v147_v37, %v111_v6 }
 0x13c   :  { %v155_v41 = vrot.slane %v142_v38, %v146_v32 }
 0x13e   :  { %v157_v42 = vadd.f32 %v155_v41, %v149_v39  ;;  %v158_v43 = vadd.f32 %v155_v41, %v150_v40 }
 0x140   :  { %v159_v44 = vmax.f32 %v157_v42, 0.0  ;;  %v160_v45 = vmax.f32 %v158_v43, 0.0 }
 0x142   :  { %162 = vst [vmem:[#allocation7 + $0x8] sm:$0xff] %v160_v45  ;;  %161 = vst [vmem:[#allocation7] sm:$0xff] %v159_v44 }
 0x143   :  { %265 = shalt.err (!%p262_p6)
}
 0x144   :  { %s266_s20 = scalar_lea.hbm %s362_s4, 256 }
 0x145   :  { %p267_p7 = scmp.ne.s32.totalorder %s362_s4, %s266_s20  ;;  %p270_p8 = scmp.lt.u32.totalorder %s266_s20, %s362_s4 }
 0x147   :  { %p272_p9 = pnand %p270_p8, %p267_p7 }
 0x149   :  { %275 = shalt.err (!%p272_p9)
}
 0x14a   :  { %s289_s25 = smov 128   ;;  %s290_s26 = smov 8  }
 0x14b   :  { %174 = dma.vmem_to_hbm [thread:$0]  %s169_s18, 256, %s362_s4, [#allocation4], %s289_s25, %s289_s25, %s290_s26  }
 0x14c   :  { %280 = dma.done.wait [#allocation4], 256  }
 0x14d   :  { %281 = vsyncadd [#allocation4], 4294967040 }
 0x14e   :  { %178 = vsyncpa [#allocation3], 1 }
 0x14f   :  { %179 = vsyncpa [#allocation6], 1 }
 0x150   :  { %180 = vsyncpa [#allocation4], 1 }

</bundles_post_ra>
